<compile_context>
chip_gen: v7x
topology: tpu7x:2x2x1
jax: 0.10.0
libtpu: 0.0.40
codegen_flags: <defaults>
</compile_context>

<pallas_src>
import jax
import jax.numpy as jnp
from jax.experimental import pallas as pl
from jax.experimental.pallas import tpu as pltpu


def critic_kernel(x_ref, w1_ref, b1_ref, w2_ref, b2_ref, o_ref):
    # Hidden layer on the MXU: (TB, I) @ (I, H) -> (TB, H), f32 accumulate.
    h = jnp.dot(x_ref[...], w1_ref[...], preferred_element_type=jnp.float32)
    h = jnp.maximum(h + b1_ref[...], 0.0)  # bias + ReLU on the VPU (f32)
    # Value head (output width 1): VPU multiply + lane reduce instead of a
    # 1-column MXU matmul (avoids 1/256 MXU utilization + serialized drain).
    v = jnp.sum(h * w2_ref[...], axis=-1, keepdims=True)  # (TB, 1), f32
    o_ref[...] = (v + b2_ref[0]).astype(o_ref.dtype)


def _round_up(v, m):
    return ((v + m - 1) // m) * m


def critic_forward(x, w1, b1, w2, b2, *, tb=8192, stream_bf16=True):
    """x: [B, I], w1: [I, H], b1: [1, H], w2: [H, 1], b2: [1, 1] -> [B, 1]."""
    B, I = x.shape
    H = w1.shape[1]

    # Batch tile: as large as possible up to `tb`, sublane (8) aligned.
    TB = max(8, (min(tb, _round_up(B, 8)) // 8) * 8)
    # v7x: guarantee >= 2 grid steps when the batch allows it, so both
    # TensorCores get work under dimension_semantics=("parallel",).
    if B > 8 and TB >= B:
        TB = max(8, _round_up(pl.cdiv(B, 2), 8))
    grid = (pl.cdiv(B, TB),)

    # Stream the two MXU operands as bf16 (x is the dominant HBM stream).
    # NOTE: in a real pipeline x would already arrive as bf16; the cast here
    # is the drop-in form; accumulation and all VPU math stay f32.
    if stream_bf16:
        x_in = x.astype(jnp.bfloat16)
        w1_in = w1.astype(jnp.bfloat16)
    else:
        x_in, w1_in = x, w1

    b1_row = b1.reshape(1, H).astype(jnp.float32)   # resident bias row
    w2_row = w2.reshape(1, H).astype(jnp.float32)   # value head as a row
    b2_s = b2.reshape(1).astype(jnp.float32)        # true 1-D SMEM scalar

    in_bytes = x_in.dtype.itemsize
    cost = pl.CostEstimate(
        flops=2 * B * I * H + 3 * B * H,
        transcendentals=0,
        bytes_accessed=B * I * in_bytes + I * H * in_bytes + 2 * H * 4 + 4 + B * 4,
    )

    out = pl.pallas_call(
        critic_kernel,
        out_shape=jax.ShapeDtypeStruct((B, 1), jnp.float32),
        grid=grid,
        in_specs=[
            pl.BlockSpec((TB, I), lambda b: (b, 0)),   # streamed batch tiles
            pl.BlockSpec((I, H), lambda b: (0, 0)),    # resident weights
            pl.BlockSpec((1, H), lambda b: (0, 0)),    # resident bias row
            pl.BlockSpec((1, H), lambda b: (0, 0)),    # resident value-head row
            pl.BlockSpec(memory_space=pltpu.MemorySpace.SMEM),  # b2 scalar
        ],
        out_specs=pl.BlockSpec((TB, 1), lambda b: (b, 0)),
        compiler_params=pltpu.CompilerParams(
            dimension_semantics=("parallel",),
        ),
        cost_estimate=cost,
    )(x_in, w1_in, b1_row, w2_row, b2_s)

    return out


def init_params(key, i, h):
    """Deterministic init mimicking nn.Linear default (uniform +-1/sqrt(fan_in))."""
    k1, k2, k3, k4 = jax.random.split(key, 4)
    bound1 = 1.0 / jnp.sqrt(i)
    bound2 = 1.0 / jnp.sqrt(h)
    # Stored already transposed: [in, out]
    w1 = jax.random.uniform(k1, (i, h), jnp.float32, -bound1, bound1)
    b1 = jax.random.uniform(k2, (1, h), jnp.float32, -bound1, bound1)
    w2 = jax.random.uniform(k3, (h, 1), jnp.float32, -bound2, bound2)
    b2 = jax.random.uniform(k4, (1, 1), jnp.float32, -bound2, bound2)
    return w1, b1, w2, b2


if __name__ == "__main__":
    I, H = 32, 64  # CriticModel(i=32, h=64)

    key = jax.random.PRNGKey(0)
    kx, kp, kx2 = jax.random.split(key, 3)
    w1, b1, w2, b2 = init_params(kp, I, H)

    def ref_fwd(xx):
        return jnp.maximum(xx @ w1 + b1, 0.0) @ w2 + b2

    # 1) Small batch, exact f32 path (bit-level parity with the PyTorch module).
    B = 8
    x = jax.random.normal(kx, (B, I), jnp.float32)
    out = jax.block_until_ready(
        critic_forward(x, w1, b1, w2, b2, stream_bf16=False))
    assert out.shape == (B, 1)
    assert jnp.allclose(out, ref_fwd(x), atol=1e-5, rtol=1e-5)

    # 2) Non-multiple-of-tile batch: multi-step grid, masked partial last
    #    block (no wrapper pad), bf16-streamed x/W1.
    B2 = 300
    x2 = jax.random.normal(kx2, (B2, I), jnp.float32)
    out2 = jax.block_until_ready(critic_forward(x2, w1, b1, w2, b2, tb=128))
    assert out2.shape == (B2, 1)
    assert jnp.allclose(out2, ref_fwd(x2), atol=3e-2, rtol=3e-2)

    # 3) Default large-tile path (TB auto-capped so the grid has >= 2 steps).
    out3 = jax.block_until_ready(critic_forward(x2, w1, b1, w2, b2))
    assert out3.shape == (B2, 1)
    assert jnp.allclose(out3, ref_fwd(x2), atol=3e-2, rtol=3e-2)

    print("KERNEL_OK")
</pallas_src>

<mosaic_0001>
module attributes {stable_mosaic.version = 11 : i64} {
  func.func @critic_kernel(%arg0: i32, %arg1: memref<8x32xf32, #tpu.memory_space<vmem>>, %arg2: memref<32x64xf32, #tpu.memory_space<vmem>>, %arg3: memref<1x64xf32, #tpu.memory_space<vmem>>, %arg4: memref<1x64xf32, #tpu.memory_space<vmem>>, %arg5: memref<1xf32, #tpu.memory_space<smem>>, %arg6: memref<8x1xf32, #tpu.memory_space<vmem>>) attributes {dimension_semantics = [#tpu.dimension_semantics<parallel>], iteration_bounds = array<i64: 1>, scalar_prefetch = 0 : i64, scratch_operands = 0 : i64, tpu.core_type = #tpu.core_type<tc>, window_params = [{transform_indices = @transform_0, window_bounds = array<i64: 8, 32>}, {pipeline_mode = #tpu.pipeline_mode<synchronous>, transform_indices = @transform_1, window_bounds = array<i64: 32, 64>}, {pipeline_mode = #tpu.pipeline_mode<synchronous>, transform_indices = @transform_2, window_bounds = array<i64: 1, 64>}, {pipeline_mode = #tpu.pipeline_mode<synchronous>, transform_indices = @transform_3, window_bounds = array<i64: 1, 64>}, {transform_indices = @transform_4, window_bounds = array<i64: 1>}, {transform_indices = @transform_5, window_bounds = array<i64: 8, 1>}]} {
    %c0 = arith.constant 0 : index
    %c0_0 = arith.constant 0 : index
    %0 = vector.load %arg1[%c0, %c0_0] : memref<8x32xf32, #tpu.memory_space<vmem>>, vector<8x32xf32>
    %c0_1 = arith.constant 0 : index
    %c0_2 = arith.constant 0 : index
    %1 = vector.load %arg2[%c0_1, %c0_2] : memref<32x64xf32, #tpu.memory_space<vmem>>, vector<32x64xf32>
    %cst = arith.constant dense<0.000000e+00> : vector<8x64xf32>
    %2 = tpu.matmul %0, %1, %cst {dimension_numbers = #tpu.dot_dimension_numbers<[1], [0], [0], [1], [0, 0, 1, 1], [], []>} : vector<8x32xf32>, vector<32x64xf32>, vector<8x64xf32> -> vector<8x64xf32>
    %c0_3 = arith.constant 0 : index
    %c0_4 = arith.constant 0 : index
    %3 = vector.load %arg3[%c0_3, %c0_4] : memref<1x64xf32, #tpu.memory_space<vmem>>, vector<1x64xf32>
    %4 = vector.broadcast %3 : vector<1x64xf32> to vector<8x64xf32>
    %5 = arith.addf %2, %4 : vector<8x64xf32>
    %cst_5 = arith.constant 0.000000e+00 : f32
    %6 = vector.broadcast %cst_5 : f32 to vector<8x64xf32>
    %7 = arith.maximumf %5, %6 : vector<8x64xf32>
    %c0_6 = arith.constant 0 : index
    %c0_7 = arith.constant 0 : index
    %8 = vector.load %arg4[%c0_6, %c0_7] : memref<1x64xf32, #tpu.memory_space<vmem>>, vector<1x64xf32>
    %9 = vector.broadcast %8 : vector<1x64xf32> to vector<8x64xf32>
    %10 = arith.mulf %7, %9 : vector<8x64xf32>
    %cst_8 = arith.constant dense<0.000000e+00> : vector<8xf32>
    %11 = vector.multi_reduction <add>, %10, %cst_8 [1] : vector<8x64xf32> to vector<8xf32>
    %12 = vector.shape_cast %11 : vector<8xf32> to vector<8x1xf32>
    %c0_9 = arith.constant 0 : index
    %13 = memref.load %arg5[%c0_9] : memref<1xf32, #tpu.memory_space<smem>>
    %14 = vector.broadcast %13 : f32 to vector<8x1xf32>
    %15 = arith.addf %12, %14 : vector<8x1xf32>
    %c0_10 = arith.constant 0 : index
    %c0_11 = arith.constant 0 : index
    %16 = vector.load %arg6[%c0_10, %c0_11] : memref<8x1xf32, #tpu.memory_space<vmem>>, vector<8x1xf32>
    tpu.vector_store %arg6[%c0_10, %c0_11], %15 {strides = array<i32>} : memref<8x1xf32, #tpu.memory_space<vmem>>, vector<8x1xf32>,
    return
  }
  func.func @transform_0(%arg0: i32) -> (i32, i32) {
    %c0_i32 = arith.constant 0 : i32
    %c0_i32_0 = arith.constant 0 : i32
    return %arg0, %c0_i32 : i32, i32
  }
  func.func @transform_1(%arg0: i32) -> (i32, i32) {
    %c0_i32 = arith.constant 0 : i32
    %c0_i32_0 = arith.constant 0 : i32
    %c0_i32_1 = arith.constant 0 : i32
    return %c0_i32, %c0_i32_0 : i32, i32
  }
  func.func @transform_2(%arg0: i32) -> (i32, i32) {
    %c0_i32 = arith.constant 0 : i32
    %c0_i32_0 = arith.constant 0 : i32
    %c0_i32_1 = arith.constant 0 : i32
    return %c0_i32, %c0_i32_0 : i32, i32
  }
  func.func @transform_3(%arg0: i32) -> (i32, i32) {
    %c0_i32 = arith.constant 0 : i32
    %c0_i32_0 = arith.constant 0 : i32
    %c0_i32_1 = arith.constant 0 : i32
    return %c0_i32, %c0_i32_0 : i32, i32
  }
  func.func @transform_4(%arg0: i32) -> i32 {
    %c0_i32 = arith.constant 0 : i32
    %c0_i32_0 = arith.constant 0 : i32
    return %c0_i32 : i32
  }
  func.func @transform_5(%arg0: i32) -> (i32, i32) {
    %c0_i32 = arith.constant 0 : i32
    %c0_i32_0 = arith.constant 0 : i32
    return %arg0, %c0_i32 : i32, i32
  }
}

</mosaic_0001>

<bundles_post_ra>
// kernel: tpu_custom_call.1
= control target key start
LH: loop header
LB: loop body
LE: loop exit
PB: predicated region body
PF: predicated region fallthrough
CT: control target
= control target key end

     0   :  { %11 = vsyncpa [#allocation4], 0  ;;  %s317_s0 = inlined_call_operand.hbm [shape: f32[8,32], index: 0, kind: input, shape index: {}]   ;;  %s318_s1 = inlined_call_operand.hbm [shape: f32[32,64], index: 1, kind: input, shape index: {}]   ;;  %s319_s2 = inlined_call_operand.vmem [shape: f32[1,64], index: 2, kind: input, shape index: {}]   ;;  %s320_s3 = inlined_call_operand.vmem [shape: f32[1,64], index: 3, kind: input, shape index: {}]   ;;  %s321_s4 = inlined_call_operand.<no memory space> [shape: f32[1], index: 4, kind: input, shape index: {}]   ;;  %s322_s5 = inlined_call_operand.vmem [shape: f32[8,1], index: 5, kind: output, shape index: {}]  }
   0x1   :  { %12 = vsyncpa [#allocation6], 0  ;;  %s237_s18 = smov [#allocation3]   ;;  %s238_s20 = smov [#allocation5]  }
   0x2   :  { %s19_s19 = sshll.u32 %s237_s18, 4  ;;  %s28_s21 = sshll.u32 %s238_s20, 4  ;;  %s20_s19 = int_to_ptr.vmem [resolvable:$true] %s19_s19  ;;  %s274_s21 = int_to_ptr.vmem [resolvable:$true] %s28_s21 }
   0x3   :  { %s189_s24 = scalar_lea.hbm %s317_s0, 128 }
   0x4   :  { %p190_p0 = scmp.ne.s32.totalorder %s317_s0, %s189_s24  ;;  %p193_p1 = scmp.lt.u32.totalorder %s189_s24, %s317_s0 }
   0x6   :  { %p195_p2 = pnand %p193_p1, %p190_p0 }
   0x8   :  { %198 = shalt.err (!%p195_p2)
}
   0x9   :  { %s199_s29 = scalar_lea.vmem %s20_s19, 128  ;;  %p204_p4 = scmp.lt.s32.totalorder %s20_s19, %s20_s19 }
   0xa   :  { %p200_p3 = scmp.ne.s32.totalorder %s20_s19, %s199_s29  ;;  %p205_p5 = scmp.lt.s32.totalorder %s199_s29, %s199_s29 }
   0xc   :  { %p206_p6 = por %p205_p5, %p204_p4 }
   0xe   :  { %p207_p7 = pnand %p206_p6, %p200_p3 }
  0x10   :  { %210 = shalt.err (!%p207_p7)
}
  0x11   :  { %22 = dma.hbm_to_vmem [thread:$0]  %s317_s0, 128, %s20_s19, [#allocation4]  }
  0x12   :  { %s211_s9 = scalar_lea.hbm %s318_s1, 512 }
  0x13   :  { %p212_p8 = scmp.ne.s32.totalorder %s318_s1, %s211_s9  ;;  %p215_p9 = scmp.lt.u32.totalorder %s211_s9, %s318_s1 }
  0x15   :  { %p217_p10 = pnand %p215_p9, %p212_p8 }
  0x17   :  { %220 = shalt.err (!%p217_p10)
}
  0x18   :  { %s221_s14 = scalar_lea.vmem %s274_s21, 512  ;;  %p226_p12 = scmp.lt.s32.totalorder %s274_s21, %s274_s21 }
  0x19   :  { %p222_p11 = scmp.ne.s32.totalorder %s274_s21, %s221_s14  ;;  %p227_p13 = scmp.lt.s32.totalorder %s221_s14, %s221_s14 }
  0x1b   :  { %p228_p0 = por %p227_p13, %p226_p12 }
  0x1d   :  { %p229_p1 = pnand %p228_p0, %p222_p11 }
  0x1f   :  { %232 = shalt.err (!%p229_p1)
}
  0x20   :  { %s239_s0 = smov 128   ;;  %s240_s15 = smov 8  }
  0x21   :  { %34 = dma.hbm_to_vmem [thread:$0]  %s318_s1, 512, %s274_s21, [#allocation6], %s239_s0, %s239_s0, %s240_s15  }
  0x22   :  { %233 = dma.done.wait [#allocation4], 128  }
  0x23   :  { %234 = vsyncadd [#allocation4], 4294967168 }
  0x24   :  { %235 = dma.done.wait [#allocation6], 512  }
  0x25   :  { %236 = vsyncadd [#allocation6], 4294966784  ;;  %v241_v0 = vmov 0.0|0.0   ;;  %vm242_vm0 = vmmov 0   ;;  %v243_v1 = vmov 0.0   ;;  %v48_v2 = vld [vmem:[#allocation5] sm:$0xff]  ;;  %v147_v17 = vstv %s321_s4 }
  0x26   :  { %176 = vmatprep.subr.bf16.mxu0 %v241_v0  ;;  %173 = vmatprep.mubr.msk.f32.mxu0 %vm242_vm0, %v243_v1  ;;  %v49_v3 = vld [vmem:[#allocation5 + $0x8] sm:$0xff]  ;;  %v50_v4 = vld [vmem:[#allocation5 + $0x10] sm:$0xff]  ;;  %v51_v6 = vld [vmem:[#allocation5 + $0x18] sm:$0xff]  ;;  %vm59_vm1 = vcmask 261120   ;;  %vm142_vm2 = vcmask 523264   ;;  %vm149_vm3 = vcmask 7168  }
  0x27   :  { %v177_v5 = vpack.c.bf16 %v49_v3, %v48_v2  ;;  %v180_v7 = vpack.c.bf16 %v51_v6, %v50_v4  ;;  %v47_v8 = vld [vmem:[#allocation3] sm:$0xff] }
  0x28   :  { %v157_v9 = vld [vmem:[%s319_s2] ss:$0 sm:$0xff] }
  0x29   :  { %178 = vmatpush3.bf16.msra.mxu0 %v177_v5  ;;  %v159_v13 = vld [vmem:[%s320_s3] ss:$0 sm:$0xff] }
  0x2a   :  { %179 = vmatprep.subr.bf16.mxu0 %v241_v0 }
  0x2d   :  { %181 = vmatpush3.bf16.msra.mxu0 %v180_v7 }
  0x30   :  { %174 = vmatmul.mubr.msk.f32.vlgmr.msra.gmra.mrb[0].mxu0 %vm59_vm1, %v47_v8 }
 0x103   :  { %v129_v10 = vpop.f32.mrb[0].mxu0 }
 0x104   :  { %v130_v11 = vadd.f32 %v157_v9, %v129_v10  ;;  %v175_v12 = vpop.f32.mrb[1].mxu0 }
 0x106   :  { %v133_v14 = vmax.f32 %v130_v11, 0.0 }
 0x108   :  { %v141_v15 = vmul.f32 %v159_v13, %v133_v14 }
 0x10a   :  { %v143_v16 = vsel %vm142_vm2, %v141_v15, 0.0 }
 0x10b   :  { %144 = vadd.xlane.f32.xlu0 %v143_v16 }
 0x198   :  { %v145_v18 = vpop.xlane.xlu0 %144 }
 0x199   :  { %v148_v19 = vadd.f32 %v147_v17, %v145_v18 }
 0x19b   :  { %150 = vst.msk [vmem:[%s322_s5] sm:$0xff] %vm149_vm3, %v148_v19 }
 0x19c   :  { %155 = vsyncpa [#allocation4], 1 }
 0x19d   :  { %156 = vsyncpa [#allocation6], 1 }

</bundles_post_ra>
